<compile_context>
chip_gen: v5e
topology: v5e:2x2
jax: 0.10.0
libtpu: 0.0.40
codegen_flags: <defaults>
</compile_context>

<pallas_src>
import jax
import jax.numpy as jnp
from jax.experimental import pallas as pl
from jax.experimental.pallas import tpu as pltpu


def _round_up(x, m):
    return ((x + m - 1) // m) * m


def _make_kernel():
    """Kernel: one batch tile. state tile [TM, D+1] -> fused update [TM, D+1]."""

    def kernel(t_ref, state_ref, w1p_ref, b1_ref, w2p_ref, cp_ref, bias_ref,
               out_ref):
        t = t_ref[0]                                   # scalar time from SMEM
        # Hidden layer on the full [TM, D+1] tile (W1 carries a zero row for
        # the dlogp column -> mathematically identical to xs @ W1, no slice).
        h = jnp.tanh(
            jnp.dot(state_ref[...], w1p_ref[...],
                    preferred_element_type=jnp.float32)
            + t * b1_ref[...]
        )
        # Fused [dxs | div] in one tile, all through the MXU:
        #   columns [0, D): h @ W2
        #   column  D     : (h*h) @ c - sum(c)  ==  -sum_k (1 - h_k^2) c_k
        out = (
            jnp.dot(h, w2p_ref[...], preferred_element_type=jnp.float32)
            + jnp.dot(h * h, cp_ref[...], preferred_element_type=jnp.float32)
            + bias_ref[...]
        )
        out_ref[...] = out.astype(out_ref.dtype)       # single full-width store

    return kernel


def make_anode_dynamics(n_dim, n_hidden, dtype=jnp.float32, max_batch_tile=2048):
    """Builds deterministic parameters and returns (anode_dynamics, reference)."""
    key = jax.random.PRNGKey(0)
    k1, k2, k3 = jax.random.split(key, 3)
    w1 = (jax.random.normal(k1, (n_dim, n_hidden), dtype)
          / jnp.sqrt(jnp.asarray(n_dim, dtype)))
    b1 = jax.random.normal(k2, (1, n_hidden), dtype) * jnp.asarray(0.1, dtype)
    w2 = (jax.random.normal(k3, (n_hidden, n_dim), dtype)
          / jnp.sqrt(jnp.asarray(n_hidden, dtype)))
    # c[k] = sum_i W1[i, k] * W2[k, i]  (exact trace contraction, precomputed)
    c_row = jnp.sum(w1.T * w2, axis=-1)[None, :].astype(dtype)        # [1, H]

    d1 = n_dim + 1
    # ---- kernel-side packed parameters (precomputed once on the host) ----
    w1_pad = jnp.concatenate([w1, jnp.zeros((1, n_hidden), dtype)],
                             axis=0)                                  # [D+1, H]
    w2_pad = jnp.concatenate([w2, jnp.zeros((n_hidden, 1), dtype)],
                             axis=1)                                  # [H, D+1]
    c_pad = jnp.concatenate([jnp.zeros((n_hidden, n_dim), dtype), c_row.T],
                            axis=1)                                   # [H, D+1]
    bias_out = jnp.concatenate(
        [jnp.zeros((1, n_dim), dtype),
         -jnp.sum(c_row, axis=-1, keepdims=True)], axis=1).astype(dtype)  # [1, D+1]

    kernel = _make_kernel()

    def _call_kernel(t_arr, state):
        n_batch = state.shape[0]
        # Batch tile: ceil(B/2) rounded up to 8 sublanes, capped at 2048 rows.
        # => >=2 grid steps whenever B >= 16 (both v7x TensorCores get work on
        # the "parallel" axis), and at most a handful of grid steps overall so
        # the ~0.35 us/step overhead stays negligible.  Per-tile VMEM at
        # tm=2048 is ~1 MiB double-buffered -> far below any scoped limit.
        tm = min(max_batch_tile, max(8, _round_up(pl.cdiv(n_batch, 2), 8)))
        nb = pl.cdiv(n_batch, tm)

        flops = 6 * n_batch * n_hidden * d1 + 4 * n_batch * n_hidden
        bytes_accessed = 4 * (2 * n_batch * d1        # state in + update out
                              + d1 * n_hidden         # w1_pad
                              + 2 * n_hidden * d1     # w2_pad, c_pad
                              + n_hidden + d1)        # b1, bias

        return pl.pallas_call(
            kernel,
            grid=(nb,),
            in_specs=[
                pl.BlockSpec(memory_space=pltpu.MemorySpace.SMEM),   # t
                pl.BlockSpec((tm, d1), lambda i: (i, 0)),            # state tile
                pl.BlockSpec((d1, n_hidden), lambda i: (0, 0)),      # w1_pad (resident)
                pl.BlockSpec((1, n_hidden), lambda i: (0, 0)),       # b1     (resident)
                pl.BlockSpec((n_hidden, d1), lambda i: (0, 0)),      # w2_pad (resident)
                pl.BlockSpec((n_hidden, d1), lambda i: (0, 0)),      # c_pad  (resident)
                pl.BlockSpec((1, d1), lambda i: (0, 0)),             # bias   (resident)
            ],
            out_specs=pl.BlockSpec((tm, d1), lambda i: (i, 0)),
            out_shape=jax.ShapeDtypeStruct((n_batch, d1), dtype),
            compiler_params=pltpu.CompilerParams(
                dimension_semantics=("parallel",),   # v7x: split batch over 2 TCs
            ),
            cost_estimate=pl.CostEstimate(
                flops=flops,
                transcendentals=n_batch * n_hidden,   # tanh
                bytes_accessed=bytes_accessed,
            ),
        )(t_arr, state, w1_pad, b1, w2_pad, c_pad, bias_out)

    @jax.jit
    def anode_dynamics(t, state):
        # --- AnodeDynamics.forward semantics, fully fused in the kernel ---
        # (xs split, dynamics eval, and [dxs, div] concat all happen in-kernel;
        #  dlogp = state[:, -1:] is carried but unused by this dynamics.)
        t_arr = jnp.reshape(t, (1,)).astype(dtype)
        return _call_kernel(t_arr, state)             # [B, D + 1]

    def reference(t, state):
        xs = state[:, :-1]
        h = jnp.tanh(jnp.dot(xs, w1, precision=jax.lax.Precision.HIGHEST)
                     + t * b1)
        dxs = jnp.dot(h, w2, precision=jax.lax.Precision.HIGHEST)
        div = -jnp.sum((1.0 - h * h) * c_row, axis=-1, keepdims=True)
        return jnp.concatenate([dxs, div], axis=-1)

    return anode_dynamics, reference


if __name__ == "__main__":
    n_dim, n_hidden = 32, 64
    anode_dynamics, reference = make_anode_dynamics(n_dim, n_hidden)
    t = jnp.float32(0.37)

    # Small single-block check.
    state_small = jax.random.normal(jax.random.PRNGKey(0), (8, n_dim + 1),
                                    jnp.float32)
    out_small = jax.block_until_ready(anode_dynamics(t, state_small))
    assert out_small.shape == (8, n_dim + 1)
    assert jnp.allclose(out_small, reference(t, state_small),
                        atol=1e-4, rtol=1e-4)

    # Partial-last-block check (B not a multiple of the tile; masked writeback).
    state_odd = jax.random.normal(jax.random.PRNGKey(2), (20, n_dim + 1),
                                  jnp.float32)
    out_odd = jax.block_until_ready(anode_dynamics(t, state_odd))
    assert out_odd.shape == (20, n_dim + 1)
    assert jnp.allclose(out_odd, reference(t, state_odd), atol=1e-4, rtol=1e-4)

    # Multi-block grid check (two 512-row tiles on the parallel axis).
    state_big = jax.random.normal(jax.random.PRNGKey(1), (1024, n_dim + 1),
                                  jnp.float32)
    out_big = jax.block_until_ready(anode_dynamics(t, state_big))
    assert out_big.shape == (1024, n_dim + 1)
    assert jnp.allclose(out_big, reference(t, state_big), atol=1e-4, rtol=1e-4)

    print("KERNEL_OK")
</pallas_src>

<mosaic_0001>
module attributes {stable_mosaic.version = 11 : i64} {
  func.func @kernel(%arg0: i32, %arg1: memref<1xf32, #tpu.memory_space<smem>>, %arg2: memref<8x33xf32, #tpu.memory_space<vmem>>, %arg3: memref<33x64xf32, #tpu.memory_space<vmem>>, %arg4: memref<1x64xf32, #tpu.memory_space<vmem>>, %arg5: memref<64x33xf32, #tpu.memory_space<vmem>>, %arg6: memref<64x33xf32, #tpu.memory_space<vmem>>, %arg7: memref<1x33xf32, #tpu.memory_space<vmem>>, %arg8: memref<8x33xf32, #tpu.memory_space<vmem>>) attributes {dimension_semantics = [#tpu.dimension_semantics<parallel>], iteration_bounds = array<i64: 1>, scalar_prefetch = 0 : i64, scratch_operands = 0 : i64, tpu.core_type = #tpu.core_type<tc>, window_params = [{transform_indices = @transform_0, window_bounds = array<i64: 1>}, {transform_indices = @transform_1, window_bounds = array<i64: 8, 33>}, {pipeline_mode = #tpu.pipeline_mode<synchronous>, transform_indices = @transform_2, window_bounds = array<i64: 33, 64>}, {pipeline_mode = #tpu.pipeline_mode<synchronous>, transform_indices = @transform_3, window_bounds = array<i64: 1, 64>}, {pipeline_mode = #tpu.pipeline_mode<synchronous>, transform_indices = @transform_4, window_bounds = array<i64: 64, 33>}, {pipeline_mode = #tpu.pipeline_mode<synchronous>, transform_indices = @transform_5, window_bounds = array<i64: 64, 33>}, {pipeline_mode = #tpu.pipeline_mode<synchronous>, transform_indices = @transform_6, window_bounds = array<i64: 1, 33>}, {transform_indices = @transform_7, window_bounds = array<i64: 8, 33>}]} {
    %c0 = arith.constant 0 : index
    %0 = memref.load %arg1[%c0] : memref<1xf32, #tpu.memory_space<smem>>
    %c0_0 = arith.constant 0 : index
    %c0_1 = arith.constant 0 : index
    %1 = vector.load %arg2[%c0_0, %c0_1] : memref<8x33xf32, #tpu.memory_space<vmem>>, vector<8x33xf32>
    %c0_2 = arith.constant 0 : index
    %c0_3 = arith.constant 0 : index
    %2 = vector.load %arg3[%c0_2, %c0_3] : memref<33x64xf32, #tpu.memory_space<vmem>>, vector<33x64xf32>
    %cst = arith.constant dense<0.000000e+00> : vector<8x64xf32>
    %3 = tpu.matmul %1, %2, %cst {dimension_numbers = #tpu.dot_dimension_numbers<[1], [0], [0], [1], [0, 0, 1, 1], [], []>} : vector<8x33xf32>, vector<33x64xf32>, vector<8x64xf32> -> vector<8x64xf32>
    %c0_4 = arith.constant 0 : index
    %c0_5 = arith.constant 0 : index
    %4 = vector.load %arg4[%c0_4, %c0_5] : memref<1x64xf32, #tpu.memory_space<vmem>>, vector<1x64xf32>
    %5 = vector.broadcast %0 : f32 to vector<1x64xf32>
    %6 = arith.mulf %5, %4 : vector<1x64xf32>
    %7 = vector.broadcast %6 : vector<1x64xf32> to vector<8x64xf32>
    %8 = arith.addf %3, %7 : vector<8x64xf32>
    %9 = math.tanh %8 : vector<8x64xf32>
    %c0_6 = arith.constant 0 : index
    %c0_7 = arith.constant 0 : index
    %10 = vector.load %arg5[%c0_6, %c0_7] : memref<64x33xf32, #tpu.memory_space<vmem>>, vector<64x33xf32>
    %cst_8 = arith.constant dense<0.000000e+00> : vector<8x33xf32>
    %11 = tpu.matmul %9, %10, %cst_8 {dimension_numbers = #tpu.dot_dimension_numbers<[1], [0], [0], [1], [0, 0, 1, 1], [], []>} : vector<8x64xf32>, vector<64x33xf32>, vector<8x33xf32> -> vector<8x33xf32>
    %12 = arith.mulf %9, %9 : vector<8x64xf32>
    %c0_9 = arith.constant 0 : index
    %c0_10 = arith.constant 0 : index
    %13 = vector.load %arg6[%c0_9, %c0_10] : memref<64x33xf32, #tpu.memory_space<vmem>>, vector<64x33xf32>
    %cst_11 = arith.constant dense<0.000000e+00> : vector<8x33xf32>
    %14 = tpu.matmul %12, %13, %cst_11 {dimension_numbers = #tpu.dot_dimension_numbers<[1], [0], [0], [1], [0, 0, 1, 1], [], []>} : vector<8x64xf32>, vector<64x33xf32>, vector<8x33xf32> -> vector<8x33xf32>
    %15 = arith.addf %11, %14 : vector<8x33xf32>
    %c0_12 = arith.constant 0 : index
    %c0_13 = arith.constant 0 : index
    %16 = vector.load %arg7[%c0_12, %c0_13] : memref<1x33xf32, #tpu.memory_space<vmem>>, vector<1x33xf32>
    %17 = vector.broadcast %16 : vector<1x33xf32> to vector<8x33xf32>
    %18 = arith.addf %15, %17 : vector<8x33xf32>
    %c0_14 = arith.constant 0 : index
    %c0_15 = arith.constant 0 : index
    %19 = vector.load %arg8[%c0_14, %c0_15] : memref<8x33xf32, #tpu.memory_space<vmem>>, vector<8x33xf32>
    tpu.vector_store %arg8[%c0_14, %c0_15], %18 {strides = array<i32>} : memref<8x33xf32, #tpu.memory_space<vmem>>, vector<8x33xf32>,
    return
  }
  func.func @transform_0(%arg0: i32) -> i32 {
    %c0_i32 = arith.constant 0 : i32
    %c0_i32_0 = arith.constant 0 : i32
    return %c0_i32 : i32
  }
  func.func @transform_1(%arg0: i32) -> (i32, i32) {
    %c0_i32 = arith.constant 0 : i32
    %c0_i32_0 = arith.constant 0 : i32
    return %arg0, %c0_i32 : i32, i32
  }
  func.func @transform_2(%arg0: i32) -> (i32, i32) {
    %c0_i32 = arith.constant 0 : i32
    %c0_i32_0 = arith.constant 0 : i32
    %c0_i32_1 = arith.constant 0 : i32
    return %c0_i32, %c0_i32_0 : i32, i32
  }
  func.func @transform_3(%arg0: i32) -> (i32, i32) {
    %c0_i32 = arith.constant 0 : i32
    %c0_i32_0 = arith.constant 0 : i32
    %c0_i32_1 = arith.constant 0 : i32
    return %c0_i32, %c0_i32_0 : i32, i32
  }
  func.func @transform_4(%arg0: i32) -> (i32, i32) {
    %c0_i32 = arith.constant 0 : i32
    %c0_i32_0 = arith.constant 0 : i32
    %c0_i32_1 = arith.constant 0 : i32
    return %c0_i32, %c0_i32_0 : i32, i32
  }
  func.func @transform_5(%arg0: i32) -> (i32, i32) {
    %c0_i32 = arith.constant 0 : i32
    %c0_i32_0 = arith.constant 0 : i32
    %c0_i32_1 = arith.constant 0 : i32
    return %c0_i32, %c0_i32_0 : i32, i32
  }
  func.func @transform_6(%arg0: i32) -> (i32, i32) {
    %c0_i32 = arith.constant 0 : i32
    %c0_i32_0 = arith.constant 0 : i32
    %c0_i32_1 = arith.constant 0 : i32
    return %c0_i32, %c0_i32_0 : i32, i32
  }
  func.func @transform_7(%arg0: i32) -> (i32, i32) {
    %c0_i32 = arith.constant 0 : i32
    %c0_i32_0 = arith.constant 0 : i32
    return %arg0, %c0_i32 : i32, i32
  }
}

</mosaic_0001>

<bundles_post_ra>
// kernel: anode_dynamics.1
= control target key start
LH: loop header
LB: loop body
LE: loop exit
PB: predicated region body
PF: predicated region fallthrough
CT: control target
= control target key end

     0   :  { %13 = vsyncpa [#allocation4], 0  ;;  %s435_s0 = inlined_call_operand.<no memory space> [shape: f32[1], index: 0, kind: input, shape index: {}]   ;;  %s436_s1 = inlined_call_operand.hbm [shape: f32[8,33], index: 1, kind: input, shape index: {}]   ;;  %s437_s2 = inlined_call_operand.hbm [shape: f32[33,64], index: 2, kind: input, shape index: {}]   ;;  %s438_s3 = inlined_call_operand.vmem [shape: f32[1,64], index: 3, kind: input, shape index: {}]   ;;  %s439_s4 = inlined_call_operand.hbm [shape: f32[64,33], index: 4, kind: input, shape index: {}]   ;;  %s440_s5 = inlined_call_operand.hbm [shape: f32[64,33], index: 5, kind: input, shape index: {}]   ;;  %s441_s6 = inlined_call_operand.vmem [shape: f32[1,33], index: 6, kind: input, shape index: {}]   ;;  %s442_s7 = inlined_call_operand.hbm [shape: f32[8,33], index: 7, kind: output, shape index: {}]  }
   0x1   :  { %14 = vsyncpa [#allocation7], 0 }
   0x2   :  { %15 = vsyncpa [#allocation10], 0  ;;  %s34_s26 = sshll.u32 %s437_s2, 4  ;;  %s35_s26 = int_to_ptr.hbm [resolvable:$true] %s34_s26 }
   0x3   :  { %16 = vsyncpa [#allocation5], 0  ;;  %s362_s27 = smov [#allocation6]   ;;  %s24_s8 = sshll.u32 %s436_s1, 4  ;;  %s25_s8 = int_to_ptr.hbm [resolvable:$true] %s24_s8 }
   0x4   :  { %s36_s28 = sshll.u32 %s362_s27, 4  ;;  %s363_s9 = smov 128   ;;  %s37_s28 = int_to_ptr.vmem [resolvable:$true] %s36_s28 }
   0x5   :  { %s364_s10 = smov 8   ;;  %s365_s11 = smov [#allocation3]  }
   0x6   :  { %42 = dma.hbm_to_vmem [thread:$0]  %s35_s26, 640, %s37_s28, [#allocation7], %s363_s9, %s363_s9, %s364_s10  }
   0x7   :  { %s26_s12 = sshll.u32 %s365_s11, 4  ;;  %s49_s15 = sshll.u32 %s439_s4, 4  ;;  %s27_s12 = int_to_ptr.vmem [resolvable:$true] %s26_s12  ;;  %s50_s15 = int_to_ptr.hbm [resolvable:$true] %s49_s15 }
   0x8   :  { %29 = dma.hbm_to_vmem [thread:$0]  %s25_s8, 128, %s27_s12, [#allocation4]  }
   0x9   :  { %s62_s17 = sshll.u32 %s440_s5, 4  ;;  %s366_s18 = smov [#allocation8]   ;;  %s63_s17 = int_to_ptr.hbm [resolvable:$true] %s62_s17 }
   0xa   :  { %s51_s19 = sshll.u32 %s366_s18, 4  ;;  %s367_s1 = smov [#allocation9]   ;;  %s52_s19 = int_to_ptr.vmem [resolvable:$true] %s51_s19 }
   0xb   :  { %57 = dma.hbm_to_vmem [thread:$0]  %s50_s15, 1024, %s52_s19, [#allocation7], %s363_s9, %s363_s9, %s364_s10  }
   0xc   :  { %s64_s20 = sshll.u32 %s367_s1, 4  ;;  %s65_s20 = int_to_ptr.vmem [resolvable:$true] %s64_s20 }
   0xd   :  { %70 = dma.hbm_to_vmem [thread:$0]  %s63_s17, 1024, %s65_s20, [#allocation10], %s363_s9, %s363_s9, %s364_s10  }
   0xe   :  { %354 = dma.done.wait [#allocation4], 128  }
   0xf   :  { %355 = vsyncadd [#allocation4], 4294967168 }
  0x10   :  { %356 = dma.done.wait [#allocation7], 1664  }
  0x11   :  { %357 = vsyncadd [#allocation7], 4294965632 }
  0x12   :  { %358 = dma.done.wait [#allocation10], 1024  }
  0x13   :  { %359 = vsyncadd [#allocation10], 4294966272  ;;  %vm106_vm0 = vcmask 1040384   ;;  %v95_v0 = vld [vmem:[#allocation6 + $0x20] sm:$0x1]  ;;  %v94_v1 = vld [vmem:[#allocation6 + $0x18] sm:$0xff]  ;;  %v97_v23 = vstv %s435_s0 }
  0x14   :  { %220 = vmatpush.msk.msra.mxu0 %vm106_vm0, %v95_v0  ;;  %v93_v2 = vld [vmem:[#allocation6 + $0x10] sm:$0xff]  ;;  %v138_v3 = vld [vmem:[#allocation8 + $0x38] sm:$0xff]  ;;  %v137_v5 = vld [vmem:[#allocation8 + $0x30] sm:$0xff]  ;;  %vm102_vm1 = vcmask 269312   ;;  %vm148_vm2 = vcmask 523264   ;;  %s208_s27 = sshll.u32 %s442_s7, 4  ;;  %s209_s27 = int_to_ptr.hbm [resolvable:$true] %s208_s27 }
  0x15   :  { %v147_v4 = vld [vmem:[#allocation9 + $0x38] sm:$0xff]  ;;  %183 = vmatpush.msra.mxu2 %v138_v3  ;;  %v146_v6 = vld [vmem:[#allocation9 + $0x30] sm:$0xff]  ;;  %v92_v7 = vld [vmem:[#allocation6 + $0x8] sm:$0xff] }
  0x16   :  { %122 = vmatpush.msra.mxu0 %v94_v1  ;;  %160 = vmatpush.msra.mxu1 %v147_v4  ;;  %v136_v8 = vld [vmem:[#allocation8 + $0x28] sm:$0xff]  ;;  %v91_v9 = vld [vmem:[#allocation6] sm:$0xff]  ;;  %v90_v10 = vld [vmem:[#allocation3] sm:$0xff] }
  0x17   :  { %184 = vmatpush.msra.mxu2 %v137_v5  ;;  %v145_v11 = vld [vmem:[#allocation9 + $0x28] sm:$0xff]  ;;  %v135_v12 = vld [vmem:[#allocation8 + $0x20] sm:$0xff]  ;;  %v134_v14 = vld [vmem:[#allocation8 + $0x18] sm:$0xff] }
  0x18   :  { %123 = vmatpush.msra.mxu0 %v93_v2  ;;  %161 = vmatpush.msra.mxu1 %v146_v6  ;;  %v144_v13 = vld [vmem:[#allocation9 + $0x20] sm:$0xff]  ;;  %v143_v15 = vld [vmem:[#allocation9 + $0x18] sm:$0xff]  ;;  %v133_v16 = vld [vmem:[#allocation8 + $0x10] sm:$0xff] }
  0x19   :  { %185 = vmatpush.msra.mxu2 %v136_v8  ;;  %v142_v17 = vld [vmem:[#allocation9 + $0x10] sm:$0xff]  ;;  %v132_v18 = vld [vmem:[#allocation8 + $0x8] sm:$0xff]  ;;  %v131_v20 = vld [vmem:[#allocation8] sm:$0xff] }
  0x1a   :  { %124 = vmatpush.msra.mxu0 %v92_v7  ;;  %162 = vmatpush.msra.mxu1 %v145_v11  ;;  %v141_v19 = vld [vmem:[#allocation9 + $0x8] sm:$0xff]  ;;  %v140_v21 = vld [vmem:[#allocation9] sm:$0xff]  ;;  %v96_v22 = vld [vmem:[%s438_s3] sm:$0x1]  ;;  %s368_s3 = smov [#allocation11]  }
  0x1b   :  { %186 = vmatpush.msra.mxu2 %v135_v12  ;;  %v98_v24 = vmul.f32 %v97_v23, %v96_v22  ;;  %v231_v30 = vld [vmem:[%s441_s6] ss:$0 sm:$0xff]  ;;  %s206_s25 = sshll.u32 %s368_s3, 4  ;;  %s207_s25 = int_to_ptr.vmem [resolvable:$true] %s206_s25 }
  0x1c   :  { %125 = vmatpush.msra.mxu0 %v91_v9  ;;  %163 = vmatpush.msra.mxu1 %v144_v13 }
  0x1d   :  { %221 = vmatmul.msk.f32.vlgmr.msra.gmra.mxu0 %vm102_vm1, %v90_v10  ;;  %187 = vmatpush.msra.mxu2 %v134_v14  ;;  %v100_v25 = vperm.slane %v98_v24, 0 }
  0x1e   :  { %164 = vmatpush.msra.mxu1 %v143_v15 }
  0x1f   :  { %188 = vmatpush.msra.mxu2 %v133_v16 }
  0x20   :  { %165 = vmatpush.msra.mxu1 %v142_v17 }
  0x21   :  { %189 = vmatpush.msra.mxu2 %v132_v18 }
  0x22   :  { %166 = vmatpush.msra.mxu1 %v141_v19 }
  0x23   :  { %190 = vmatpush.msra.mxu2 %v131_v20 }
  0x24   :  { %167 = vmatpush.msra.mxu1 %v140_v21 }
  0x9a   :  { %v127_v26 = vpop.f32.mrf.mxu0 }
  0x9b   :  { %v128_v27 = vadd.f32 %v127_v26, %v100_v25 }
  0x9d   :  { %232 = vtanh.f32 %v128_v27 }
  0xa3   :  { %v233_v28 = vpop.eup %232 }
  0xa4   :  { %223 = vmatmul.msk.f32.vlgmr.msra.gmra.mxu2 %vm148_vm2, %v233_v28  ;;  %v139_v29 = vmul.f32 %v233_v28, %v233_v28 }
  0xa6   :  { %222 = vmatmul.msk.f32.vlgmr.msra.gmra.mxu1 %vm148_vm2, %v139_v29 }
 0x123   :  { %v169_v31 = vpop.f32.mrf.mxu1 }
 0x127   :  { %v192_v32 = vpop.f32.mrf.mxu2 }
 0x128   :  { %v193_v33 = vadd.f32 %v192_v32, %v169_v31 }
 0x12a   :  { %v199_v34 = vadd.f32 %v231_v30, %v193_v33 }
 0x12c   :  { %200 = vst.msk [vmem:[#allocation11] sm:$0xff] %vm102_vm1, %v199_v34 }
 0x12d   :  { %211 = dma.vmem_to_hbm [thread:$0]  %s207_s25, 128, %s209_s27, [#allocation5]  }
 0x12e   :  { %360 = dma.done.wait [#allocation5], 128  }
 0x12f   :  { %361 = vsyncadd [#allocation5], 4294967168 }
 0x130   :  { %216 = vsyncpa [#allocation4], 1 }
 0x131   :  { %217 = vsyncpa [#allocation7], 1 }
 0x132   :  { %218 = vsyncpa [#allocation10], 1 }
 0x133   :  { %219 = vsyncpa [#allocation5], 1 }

</bundles_post_ra>
